<compile_context>
chip_gen: v6e
topology: v6e:2x2x1
jax: 0.10.0
libtpu: 0.0.40
codegen_flags: <defaults>
</compile_context>

<pallas_src>
import functools
import math

import jax
import jax.numpy as jnp
from jax import lax
from jax.experimental import pallas as pl
from jax.experimental.pallas import tpu as pltpu


def _cdiv(a, b):
    return -(-a // b)


def _round_down(x, m):
    return (x // m) * m


def _sublane_align(dtype):
    """Native second-minor tile multiple for a dtype (f32: 8, bf16: 16, i8/fp8: 32)."""
    return max(8, 32 // jnp.dtype(dtype).itemsize)


def _detect_num_tensorcores(default=2):
    """Best-effort TensorCore count per chip; `default` if unknown.

    With the padding-free tiling below, an over-sized leading 'parallel' axis is
    harmless on single-TC chips (just a serial outer loop, no extra HBM traffic),
    so the fallback errs toward 2 to benefit multi-TC parts (v7x / megacore).
    """
    try:
        info = pltpu.get_tpu_info()
    except Exception:
        return default
    for name in ("num_cores", "num_tensorcores", "tensorcore_count",
                 "num_tensor_cores", "cores_per_chip"):
        val = getattr(info, name, None)
        if isinstance(val, int) and 1 <= val <= 16:
            return val
    return default


def _loss_sum(x, t, gamma):
    """f32 sum of the focal BCE-with-logits loss (identical formula to the kernel)."""
    x = x.astype(jnp.float32)
    t = t.astype(jnp.float32)
    s = jax.nn.sigmoid(x)
    pos = -t * (1.0 - s) ** gamma * jnp.log(s + 1e-10)
    neg = -(1.0 - t) * s ** gamma * jnp.log(1.0 - s + 1e-10)
    return jnp.sum(pos + neg)


def _focal_loss_kernel(x_ref, t_ref, out_ref, acc_ref, *, gamma, group_rows,
                       group_count, lane_width):
    """One (group_count * group_rows, lane_width) tile of focal BCE-with-logits.

    Grid = (p: parallel over cores, i: sequential reduction).  acc_ref is a small
    (group_rows, lane_width) f32 VMEM accumulator per core; the per-core partial
    sum is written to out_ref (SMEM) on the last i step only.
    """
    i = pl.program_id(1)

    @pl.when(i == 0)
    def _init():
        acc_ref[...] = jnp.zeros_like(acc_ref)

    def group_loss(x, t):
        x = x.astype(jnp.float32)
        t = t.astype(jnp.float32)
        s = jax.nn.sigmoid(x)
        # gamma is a static Python int -> integer_pow (VPU multiplies, no EUP pow).
        pos = -t * (1.0 - s) ** gamma * jnp.log(s + 1e-10)
        neg = -(1.0 - t) * s ** gamma * jnp.log(1.0 - s + 1e-10)
        return pos + neg

    if group_count == 1:
        acc_ref[...] += group_loss(x_ref[...], t_ref[...])
    else:
        def body(g, part):
            r0 = pl.multiple_of(g * group_rows, group_rows)
            return part + group_loss(x_ref[pl.ds(r0, group_rows), :],
                                     t_ref[pl.ds(r0, group_rows), :])

        init = jnp.zeros((group_rows, lane_width), jnp.float32)
        if group_count <= 8:
            # Short trip count: fully unroll at trace time.
            part = init
            for g in range(group_count):
                part = body(g, part)
        else:
            # Long trip count: rolled loop with a register-resident vector carry
            # (no per-group accumulator VMEM traffic), modest unroll for the
            # LLO scheduler.
            part = lax.fori_loop(0, group_count, body, init,
                                 unroll=min(group_count, 4))
        acc_ref[...] += part

    @pl.when(i == pl.num_programs(1) - 1)
    def _finalize():
        out_ref[0, 0] = jnp.sum(acc_ref[...])


def bce_logits_focal_loss(inputs, targets, gamma=2, *,
                          max_block_elems=1 << 20,
                          num_parallel=None,
                          parallel_semantics=None):
    """Pallas TPU implementation of BCELogitsFocalLoss.forward.

    inputs, targets: same-shaped arrays (any float dtype; bf16 passes through and
    is upcast per tile inside the kernel).  Returns the scalar f32 mean loss.
    """
    assert inputs.shape == targets.shape, (inputs.shape, targets.shape)

    # Keep integer gammas as Python ints so `** gamma` lowers to multiplies.
    if isinstance(gamma, float) and float(gamma).is_integer():
        gamma = int(gamma)

    total = math.prod(inputs.shape)
    if total == 0:
        return jnp.float32(float("nan"))  # torch .mean() of an empty tensor

    x_flat = inputs.reshape(-1)
    t_flat = targets.reshape(-1)

    # Largest lane width (multiple of 128) dividing the element count => the flat
    # array reshapes zero-copy to (rows, lane_width).  Otherwise fall back to 128
    # lanes and cover only the largest aligned prefix with the kernel; the tail
    # is summed in plain JAX.  No padded copy is ever materialized.
    lane_width = 128
    for lw in (512, 256, 128):
        if total % lw == 0:
            lane_width = lw
            break

    row_align = max(_sublane_align(inputs.dtype), _sublane_align(targets.dtype))
    group_rows = max(row_align, 4096 // lane_width)  # a few vregs per inner step
    max_block_rows = max(
        group_rows,
        _round_down(max(1, max_block_elems // lane_width), group_rows))

    if num_parallel is None:
        num_parallel = _detect_num_tensorcores()
    num_parallel = max(1, int(num_parallel))

    rows_full = total // lane_width
    kernel_rows = 0
    kernel_elems = 0
    if rows_full >= group_rows:
        np_eff = max(1, min(num_parallel, rows_full // group_rows))
        n_tiles = _cdiv(_cdiv(rows_full, max_block_rows), np_eff) * np_eff
        block_rows = _round_down(rows_full // n_tiles, group_rows)
        if block_rows >= group_rows:
            kernel_rows = n_tiles * block_rows
            kernel_elems = kernel_rows * lane_width

    main_sum = jnp.float32(0.0)
    if kernel_rows > 0:
        # Zero-copy reshape when lane_width divides total (kernel_elems == total);
        # only truly unaligned totals see a (prefix) slice.
        x2d = x_flat[:kernel_elems].reshape(kernel_rows, lane_width)
        t2d = t_flat[:kernel_elems].reshape(kernel_rows, lane_width)

        tiles_per_core = n_tiles // np_eff
        group_count = block_rows // group_rows

        kernel = functools.partial(
            _focal_loss_kernel, gamma=gamma, group_rows=group_rows,
            group_count=group_count, lane_width=lane_width)

        in_spec = pl.BlockSpec((block_rows, lane_width),
                               lambda p, i: (p * tiles_per_core + i, 0))

        tile_bytes = block_rows * lane_width * (
            jnp.dtype(inputs.dtype).itemsize + jnp.dtype(targets.dtype).itemsize)
        # Double-buffered input tiles + tiny accumulator + headroom; stays well
        # inside physical VMEM on v5e/v6e (128 MiB) and v7x (64 MiB).
        vmem_limit = int(max(32 << 20, 2 * tile_bytes + (8 << 20)))

        if parallel_semantics is None:
            # TODO(synk): on v7x pass parallel_semantics=pltpu.CORE_PARALLEL to
            # guarantee the 2-TensorCore split; plain "parallel" is the safe
            # default on single-TC v5e/v6e and on megacore parts.
            parallel_semantics = "parallel"

        partials = pl.pallas_call(
            kernel,
            out_shape=jax.ShapeDtypeStruct((np_eff, 1), jnp.float32),
            grid_spec=pltpu.PrefetchScalarGridSpec(
                num_scalar_prefetch=0,
                grid=(np_eff, tiles_per_core),
                in_specs=[in_spec, in_spec],
                out_specs=pl.BlockSpec((1, 1), lambda p, i: (p, 0),
                                       memory_space=pltpu.SMEM),
                scratch_shapes=[pltpu.VMEM((group_rows, lane_width), jnp.float32)],
            ),
            compiler_params=pltpu.CompilerParams(
                dimension_semantics=(parallel_semantics, "arbitrary"),
                vmem_limit_bytes=vmem_limit,
            ),
        )(x2d, t2d)
        main_sum = jnp.sum(partials)

    tail_sum = jnp.float32(0.0)
    if kernel_elems < total:
        # < one tile of leftovers (or the whole input when it is below one tile):
        # plain JAX, single fused pass, exact same formula.
        tail_sum = _loss_sum(x_flat[kernel_elems:], t_flat[kernel_elems:], gamma)

    return (main_sum + tail_sum) / jnp.float32(total)


def _reference(inputs, targets, gamma=2):
    x = inputs.astype(jnp.float32)
    t = targets.astype(jnp.float32)
    s = jax.nn.sigmoid(x)
    pos = -t * (1.0 - s) ** gamma * jnp.log(s + 1e-10)
    neg = -(1.0 - t) * s ** gamma * jnp.log(1.0 - s + 1e-10)
    return jnp.mean(pos + neg)


if __name__ == "__main__":
    key = jax.random.PRNGKey(0)
    ks = jax.random.split(key, 8)

    def check(x, t, gamma=2, rtol=1e-5, atol=1e-6):
        got = jax.block_until_ready(bce_logits_focal_loss(x, t, gamma=gamma))
        want = _reference(x, t, gamma=gamma)
        assert jnp.allclose(got, want, rtol=rtol, atol=atol), (got, want)

    # (batch=16, classes=256): lane-aligned -> zero-copy reshape, single-tile
    # kernel, no tail.
    x1 = jax.random.normal(ks[0], (16, 256), dtype=jnp.float32) * 3.0
    t1 = (jax.random.uniform(ks[1], (16, 256)) > 0.5).astype(jnp.float32)
    check(x1, t1)

    # Ragged (37, 300): unaligned total -> kernel over the aligned prefix plus a
    # small plain-JAX tail (no padded copy).
    x2 = jax.random.normal(ks[2], (37, 300), dtype=jnp.float32) * 3.0
    t2 = (jax.random.uniform(ks[3], (37, 300)) > 0.5).astype(jnp.float32)
    check(x2, t2)

    # Tiny (7, 19): below one tile -> pure plain-JAX path.
    x3 = jax.random.normal(ks[4], (7, 19), dtype=jnp.float32) * 3.0
    t3 = (jax.random.uniform(ks[5], (7, 19)) > 0.5).astype(jnp.float32)
    check(x3, t3)

    # bf16 passthrough: inputs stay bf16 in HBM (half the bytes); kernel upcasts
    # per tile and accumulates in f32.
    x4 = (jax.random.normal(ks[6], (64, 512), dtype=jnp.float32) * 3.0
          ).astype(jnp.bfloat16)
    t4 = (jax.random.uniform(ks[7], (64, 512)) > 0.5).astype(jnp.bfloat16)
    check(x4, t4, rtol=1e-4, atol=1e-5)

    print("KERNEL_OK")
</pallas_src>

<mosaic_0001>
module attributes {stable_mosaic.version = 11 : i64} {
  func.func @_focal_loss_kernel(%arg0: i32, %arg1: i32, %arg2: memref<8x512xf32, #tpu.memory_space<vmem>>, %arg3: memref<8x512xf32, #tpu.memory_space<vmem>>, %arg4: memref<1x1xf32, #tpu.memory_space<smem>>, %arg5: memref<8x512xf32, #tpu.memory_space<vmem>>) attributes {dimension_semantics = [#tpu.dimension_semantics<parallel>, #tpu.dimension_semantics<arbitrary>], iteration_bounds = array<i64: 1, 1>, scalar_prefetch = 0 : i64, scratch_operands = 1 : i64, tpu.core_type = #tpu.core_type<tc>, window_params = [{transform_indices = @transform_0, window_bounds = array<i64: 8, 512>}, {transform_indices = @transform_1, window_bounds = array<i64: 8, 512>}, {transform_indices = @transform_2, window_bounds = array<i64: 1, 1>}]} {
    %c0_i32 = arith.constant 0 : i32
    %0 = arith.cmpi eq, %arg1, %c0_i32 : i32
    %1 = arith.extui %0 : i1 to i32
    %c0_i32_0 = arith.constant 0 : i32
    %2 = arith.cmpi ne, %1, %c0_i32_0 : i32
    scf.if %2 {
      %cst_17 = arith.constant 0.000000e+00 : f32
      %39 = vector.broadcast %cst_17 : f32 to vector<8x512xf32>
      %c0_18 = arith.constant 0 : index
      %c0_19 = arith.constant 0 : index
      %40 = vector.load %arg5[%c0_18, %c0_19] : memref<8x512xf32, #tpu.memory_space<vmem>>, vector<8x512xf32>
      tpu.vector_store %arg5[%c0_18, %c0_19], %39 {strides = array<i32>} : memref<8x512xf32, #tpu.memory_space<vmem>>, vector<8x512xf32>,
    } else {
    }
    %c0 = arith.constant 0 : index
    %c0_1 = arith.constant 0 : index
    %3 = vector.load %arg5[%c0, %c0_1] : memref<8x512xf32, #tpu.memory_space<vmem>>, vector<8x512xf32>
    %c0_2 = arith.constant 0 : index
    %c0_3 = arith.constant 0 : index
    %4 = vector.load %arg2[%c0_2, %c0_3] : memref<8x512xf32, #tpu.memory_space<vmem>>, vector<8x512xf32>
    %c0_4 = arith.constant 0 : index
    %c0_5 = arith.constant 0 : index
    %5 = vector.load %arg3[%c0_4, %c0_5] : memref<8x512xf32, #tpu.memory_space<vmem>>, vector<8x512xf32>
    %6 = arith.negf %4 : vector<8x512xf32>
    %7 = math.exp %6 : vector<8x512xf32>
    %cst = arith.constant 1.000000e+00 : f32
    %8 = vector.broadcast %cst : f32 to vector<8x512xf32>
    %9 = arith.addf %8, %7 : vector<8x512xf32>
    %10 = arith.divf %8, %9 : vector<8x512xf32>
    %cst_6 = arith.constant 0.000000e+00 : f32
    %11 = vector.broadcast %cst_6 : f32 to vector<8x512xf32>
    %12 = arith.subf %11, %5 : vector<8x512xf32>
    %cst_7 = arith.constant 1.000000e+00 : f32
    %13 = vector.broadcast %cst_7 : f32 to vector<8x512xf32>
    %14 = arith.subf %13, %10 : vector<8x512xf32>
    %15 = arith.mulf %14, %14 : vector<8x512xf32>
    %16 = arith.mulf %12, %15 : vector<8x512xf32>
    %cst_8 = arith.constant 1.000000e-10 : f32
    %17 = vector.broadcast %cst_8 : f32 to vector<8x512xf32>
    %18 = arith.addf %10, %17 : vector<8x512xf32>
    %19 = math.log %18 : vector<8x512xf32>
    %20 = arith.mulf %16, %19 : vector<8x512xf32>
    %cst_9 = arith.constant 1.000000e+00 : f32
    %21 = vector.broadcast %cst_9 : f32 to vector<8x512xf32>
    %22 = arith.subf %21, %5 : vector<8x512xf32>
    %cst_10 = arith.constant 0.000000e+00 : f32
    %23 = vector.broadcast %cst_10 : f32 to vector<8x512xf32>
    %24 = arith.subf %23, %22 : vector<8x512xf32>
    %25 = arith.mulf %10, %10 : vector<8x512xf32>
    %26 = arith.mulf %24, %25 : vector<8x512xf32>
    %cst_11 = arith.constant 1.000000e+00 : f32
    %27 = vector.broadcast %cst_11 : f32 to vector<8x512xf32>
    %28 = arith.subf %27, %10 : vector<8x512xf32>
    %cst_12 = arith.constant 1.000000e-10 : f32
    %29 = vector.broadcast %cst_12 : f32 to vector<8x512xf32>
    %30 = arith.addf %28, %29 : vector<8x512xf32>
    %31 = math.log %30 : vector<8x512xf32>
    %32 = arith.mulf %26, %31 : vector<8x512xf32>
    %33 = arith.addf %20, %32 : vector<8x512xf32>
    %34 = arith.addf %3, %33 : vector<8x512xf32>
    %c0_13 = arith.constant 0 : index
    %c0_14 = arith.constant 0 : index
    %35 = vector.load %arg5[%c0_13, %c0_14] : memref<8x512xf32, #tpu.memory_space<vmem>>, vector<8x512xf32>
    tpu.vector_store %arg5[%c0_13, %c0_14], %34 {strides = array<i32>} : memref<8x512xf32, #tpu.memory_space<vmem>>, vector<8x512xf32>,
    %c0_i32_15 = arith.constant 0 : i32
    %36 = arith.cmpi eq, %arg1, %c0_i32_15 : i32
    %37 = arith.extui %36 : i1 to i32
    %c0_i32_16 = arith.constant 0 : i32
    %38 = arith.cmpi ne, %37, %c0_i32_16 : i32
    scf.if %38 {
      %c0_17 = arith.constant 0 : index
      %c0_18 = arith.constant 0 : index
      %39 = vector.load %arg5[%c0_17, %c0_18] : memref<8x512xf32, #tpu.memory_space<vmem>>, vector<8x512xf32>
      %40 = vector.shape_cast %39 : vector<8x512xf32> to vector<1x8x512xf32>
      %cst_19 = arith.constant dense<0.000000e+00> : vector<1xf32>
      %41 = vector.multi_reduction <add>, %40, %cst_19 [1, 2] : vector<1x8x512xf32> to vector<1xf32>
      %42 = vector.shape_cast %41 : vector<1xf32> to vector<1x1x1xf32>
      %43 = vector.extract %42[0, 0, 0] : f32 from vector<1x1x1xf32>
      %c0_20 = arith.constant 0 : index
      %c0_21 = arith.constant 0 : index
      %44 = memref.load %arg4[%c0_20, %c0_21] : memref<1x1xf32, #tpu.memory_space<smem>>
      memref.store %43, %arg4[%c0_20, %c0_21] : memref<1x1xf32, #tpu.memory_space<smem>>
    } else {
    }
    return
  }
  func.func @transform_0(%arg0: i32, %arg1: i32) -> (i32, i32) {
    %c1_i32 = arith.constant 1 : i32
    %0 = arith.muli %arg0, %c1_i32 : i32
    %1 = arith.addi %0, %arg1 : i32
    %c0_i32 = arith.constant 0 : i32
    %c0_i32_0 = arith.constant 0 : i32
    return %1, %c0_i32 : i32, i32
  }
  func.func @transform_1(%arg0: i32, %arg1: i32) -> (i32, i32) {
    %c1_i32 = arith.constant 1 : i32
    %0 = arith.muli %arg0, %c1_i32 : i32
    %1 = arith.addi %0, %arg1 : i32
    %c0_i32 = arith.constant 0 : i32
    %c0_i32_0 = arith.constant 0 : i32
    return %1, %c0_i32 : i32, i32
  }
  func.func @transform_2(%arg0: i32, %arg1: i32) -> (i32, i32) {
    %c0_i32 = arith.constant 0 : i32
    %c0_i32_0 = arith.constant 0 : i32
    return %arg0, %c0_i32 : i32, i32
  }
}

</mosaic_0001>

<bundles_post_ra>
// kernel: tpu_custom_call.1
= control target key start
LH: loop header
LB: loop body
LE: loop exit
PB: predicated region body
PF: predicated region fallthrough
CT: control target
= control target key end

     0   :  { %7 = vsyncpa [#allocation4], 0  ;;  %s324_s0 = inlined_call_operand.hbm [shape: f32[8,512], index: 0, kind: input, shape index: {}]   ;;  %s325_s1 = inlined_call_operand.hbm [shape: f32[8,512], index: 1, kind: input, shape index: {}]   ;;  %s326_s2 = inlined_call_operand.hbm [shape: f32[1,1], index: 2, kind: output, shape index: {}]  }
   0x1   :  { %8 = vsyncpa [#allocation7], 0 }
   0x2   :  { %9 = vsyncpa [#allocation5], 0  ;;  %s297_s9 = smov [#allocation3]   ;;  %s298_s11 = smov [#allocation6]  }
   0x3   :  { %s20_s10 = sshll.u32 %s297_s9, 4  ;;  %s34_s12 = sshll.u32 %s298_s11, 4  ;;  %s21_s10 = int_to_ptr.vmem [resolvable:$true] %s20_s10  ;;  %s35_s12 = int_to_ptr.vmem [resolvable:$true] %s34_s12 }
   0x4   :  { %s251_s13 = scalar_lea.vmem %s21_s10, 512  ;;  %p256_p1 = scmp.lt.s32.totalorder %s21_s10, %s21_s10 }
   0x5   :  { %p252_p0 = scmp.ne.s32.totalorder %s21_s10, %s251_s13  ;;  %p257_p2 = scmp.lt.s32.totalorder %s251_s13, %s251_s13 }
   0x7   :  { %p258_p3 = por %p257_p2, %p256_p1 }
   0x9   :  { %p259_p4 = pnand %p258_p3, %p252_p0 }
   0xb   :  { %262 = shalt.err (!%p259_p4)
}
   0xc   :  { %23 = dma.hbm_to_vmem [thread:$0]  %s324_s0, 512, %s21_s10, [#allocation4]  }
   0xd   :  { %s271_s16 = scalar_lea.vmem %s35_s12, 512  ;;  %p276_p6 = scmp.lt.s32.totalorder %s35_s12, %s35_s12 }
   0xe   :  { %p272_p5 = scmp.ne.s32.totalorder %s35_s12, %s271_s16  ;;  %p277_p7 = scmp.lt.s32.totalorder %s271_s16, %s271_s16 }
  0x10   :  { %p278_p8 = por %p277_p7, %p276_p6 }
  0x12   :  { %p279_p9 = pnand %p278_p8, %p272_p5 }
  0x14   :  { %282 = shalt.err (!%p279_p9)
}
  0x15   :  { %37 = dma.hbm_to_vmem [thread:$0]  %s325_s1, 512, %s35_s12, [#allocation7]  }
  0x16   :  { %291 = dma.done.wait [#allocation4], 512  }
  0x17   :  { %292 = vsyncadd [#allocation4], 4294966784 }
  0x18   :  { %293 = dma.done.wait [#allocation7], 512  }
  0x19   :  { %294 = vsyncadd [#allocation7], 4294966784  ;;  %v58_v0 = vld [vmem:[#allocation3] sm:$0xff]  ;;  %v59_v1 = vld [vmem:[#allocation3 + $0x8] sm:$0xff]  ;;  %s299_s1 = smov [#allocation8]  }
  0x1a   :  { %v60_v2 = vld [vmem:[#allocation3 + $0x10] sm:$0xff]  ;;  %v61_v3 = vld [vmem:[#allocation3 + $0x18] sm:$0xff]  ;;  %v202_v4 = vmul.f32 -1.442695, %v58_v0  ;;  %v203_v5 = vmul.f32 -1.442695, %v59_v1 }
  0x1b   :  { %v204_v6 = vmul.f32 -1.442695, %v60_v2  ;;  %v205_v7 = vmul.f32 -1.442695, %v61_v3  ;;  %v62_v32 = vld [vmem:[#allocation6] sm:$0xff]  ;;  %v63_v33 = vld [vmem:[#allocation6 + $0x8] sm:$0xff] }
  0x1c   :  { %211 = vpow2.f32 %v202_v4  ;;  %v64_v34 = vld [vmem:[#allocation6 + $0x10] sm:$0xff]  ;;  %v65_v35 = vld [vmem:[#allocation6 + $0x18] sm:$0xff]  ;;  %v122_v36 = vsub.f32 1.0, %v62_v32  ;;  %v123_v37 = vsub.f32 1.0, %v63_v33  ;;  %v90_v38 = vsub.f32 0.0, %v62_v32 }
  0x1d   :  { %213 = vpow2.f32 %v203_v5  ;;  %v124_v40 = vsub.f32 1.0, %v64_v34  ;;  %v91_v42 = vsub.f32 0.0, %v63_v33  ;;  %v125_v44 = vsub.f32 1.0, %v65_v35 }
  0x1e   :  { %215 = vpow2.f32 %v204_v6  ;;  %v92_v46 = vsub.f32 0.0, %v64_v34  ;;  %v126_v48 = vsub.f32 0.0, %v122_v36  ;;  %v93_v51 = vsub.f32 0.0, %v65_v35 }
  0x1f   :  { %217 = vpow2.f32 %v205_v7  ;;  %v127_v53 = vsub.f32 0.0, %v123_v37  ;;  %v128_v58 = vsub.f32 0.0, %v124_v40  ;;  %v129_v62 = vsub.f32 0.0, %v125_v44 }
  0x29   :  { %v212_v8 = vpop.eup %211 }
  0x2a   :  { %v214_v9 = vpop.eup %213  ;;  %v78_v10 = vadd.f32 1.0, %v212_v8 }
  0x2b   :  { %v216_v11 = vpop.eup %215  ;;  %v79_v12 = vadd.f32 1.0, %v214_v9 }
  0x2c   :  { %v218_v13 = vpop.eup %217  ;;  %v80_v14 = vadd.f32 1.0, %v216_v11  ;;  %219 = vrcp.f32 %v78_v10 }
  0x2d   :  { %v81_v15 = vadd.f32 1.0, %v218_v13  ;;  %221 = vrcp.f32 %v79_v12 }
  0x2e   :  { %223 = vrcp.f32 %v80_v14 }
  0x2f   :  { %225 = vrcp.f32 %v81_v15 }
  0x39   :  { %v220_v16 = vpop.eup %219 }
  0x3a   :  { %v222_v17 = vpop.eup %221  ;;  %v106_v18 = vadd.f32 1e-10, %v220_v16  ;;  %v94_v23 = vsub.f32 1.0, %v220_v16  ;;  %v130_v49 = vmul.f32 %v220_v16, %v220_v16 }
  0x3b   :  { %v224_v19 = vpop.eup %223  ;;  %v107_v20 = vadd.f32 1e-10, %v222_v17  ;;  %v95_v24 = vsub.f32 1.0, %v222_v17  ;;  %v131_v54 = vmul.f32 %v222_v17, %v222_v17 }
  0x3c   :  { %v226_v21 = vpop.eup %225  ;;  %v108_v22 = vadd.f32 1e-10, %v224_v19  ;;  %227 = vlog2.f32 %v106_v18  ;;  %v96_v26 = vsub.f32 1.0, %v224_v19  ;;  %v138_v28 = vadd.f32 1e-10, %v94_v23 }
  0x3d   :  { %v109_v25 = vadd.f32 1e-10, %v226_v21  ;;  %v97_v27 = vsub.f32 1.0, %v226_v21  ;;  %229 = vlog2.f32 %v107_v20  ;;  %v139_v29 = vadd.f32 1e-10, %v95_v24 }
  0x3e   :  { %231 = vlog2.f32 %v108_v22  ;;  %v140_v30 = vadd.f32 1e-10, %v96_v26  ;;  %v98_v39 = vmul.f32 %v94_v23, %v94_v23  ;;  %v99_v43 = vmul.f32 %v95_v24, %v95_v24 }
  0x3f   :  { %233 = vlog2.f32 %v109_v25  ;;  %v141_v31 = vadd.f32 1e-10, %v97_v27  ;;  %v100_v47 = vmul.f32 %v96_v26, %v96_v26  ;;  %v101_v52 = vmul.f32 %v97_v27, %v97_v27 }
  0x40   :  { %235 = vlog2.f32 %v138_v28  ;;  %v102_v56 = vmul.f32 %v98_v39, %v90_v38  ;;  %v132_v59 = vmul.f32 %v224_v19, %v224_v19  ;;  %v103_v60 = vmul.f32 %v99_v43, %v91_v42 }
  0x41   :  { %237 = vlog2.f32 %v139_v29  ;;  %v133_v63 = vmul.f32 %v226_v21, %v226_v21  ;;  %v104_v0 = vmul.f32 %v100_v47, %v92_v46  ;;  %v134_v2 = vmul.f32 %v130_v49, %v126_v48 }
  0x42   :  { %239 = vlog2.f32 %v140_v30  ;;  %v105_v4 = vmul.f32 %v101_v52, %v93_v51  ;;  %v135_v6 = vmul.f32 %v131_v54, %v127_v53  ;;  %v136_v9 = vmul.f32 %v132_v59, %v128_v58 }
  0x43   :  { %241 = vlog2.f32 %v141_v31  ;;  %v137_v13 = vmul.f32 %v133_v63, %v129_v62 }
  0x49   :  { %v228_v41 = vpop.eup %227 }
  0x4a   :  { %v230_v45 = vpop.eup %229  ;;  %v111_v57 = vmul.f32 0.6931472, %v228_v41 }
  0x4b   :  { %v232_v50 = vpop.eup %231  ;;  %v113_v61 = vmul.f32 0.6931472, %v230_v45 }
  0x4c   :  { %v234_v55 = vpop.eup %233  ;;  %v115_v1 = vmul.f32 0.6931472, %v232_v50  ;;  %v118_v8 = vmul.f32 %v111_v57, %v102_v56 }
  0x4d   :  { %v236_v3 = vpop.eup %235  ;;  %v117_v5 = vmul.f32 0.6931472, %v234_v55  ;;  %v119_v12 = vmul.f32 %v113_v61, %v103_v60 }
  0x4e   :  { %v238_v7 = vpop.eup %237  ;;  %v143_v10 = vmul.f32 0.6931472, %v236_v3  ;;  %v120_v16 = vmul.f32 %v115_v1, %v104_v0 }
  0x4f   :  { %v240_v11 = vpop.eup %239  ;;  %v145_v14 = vmul.f32 0.6931472, %v238_v7  ;;  %v121_v19 = vmul.f32 %v117_v5, %v105_v4 }
  0x50   :  { %v242_v15 = vpop.eup %241  ;;  %v147_v17 = vmul.f32 0.6931472, %v240_v11  ;;  %v150_v18 = vmul.f32 %v143_v10, %v134_v2 }
  0x51   :  { %v149_v20 = vmul.f32 0.6931472, %v242_v15  ;;  %v151_v21 = vmul.f32 %v145_v14, %v135_v6 }
  0x52   :  { %v152_v22 = vmul.f32 %v147_v17, %v136_v9  ;;  %v154_v23 = vadd.f32 %v150_v18, %v118_v8 }
  0x53   :  { %v153_v24 = vmul.f32 %v149_v20, %v137_v13  ;;  %v155_v25 = vadd.f32 %v151_v21, %v119_v12 }
  0x54   :  { %v156_v26 = vadd.f32 %v152_v22, %v120_v16 }
  0x55   :  { %v157_v27 = vadd.f32 %v153_v24, %v121_v19  ;;  %v173_v28 = vadd.f32 %v155_v25, %v154_v23 }
  0x57   :  { %v174_v29 = vadd.f32 %v173_v28, %v156_v26 }
  0x59   :  { %v175_v30 = vadd.f32 %v174_v29, %v157_v27 }
  0x5b   :  { %176 = vadd.xlane.f32.xlu0 %v175_v30 }
  0xe4   :  { %v177_v31 = vpop.xlane.xlu0 %176 }
  0xe5   :  { %v178_v32 = vrot.slane %v177_v31, 4 }
  0xe7   :  { %v179_v33 = vadd.f32 %v178_v32, %v177_v31 }
  0xe9   :  { %v180_v34 = vrot.slane %v179_v33, 2 }
  0xeb   :  { %v181_v35 = vadd.f32 %v180_v34, %v179_v33 }
  0xed   :  { %v182_v36 = vrot.slane %v181_v35, 1 }
  0xef   :  { %v183_v37 = vadd.f32 %v182_v36, %v181_v35 }
  0xf1   :  { %206 = vpush %v183_v37 }
 0x122   :  { %s207_s0 = spop %206 }
 0x123   :  { %186 = sst [smem:[#allocation8]] %s207_s0 }
 0x124   :  { %194 = dma.smem_to_hbm %s299_s1, 16, %s326_s2, [#allocation5]  }
 0x125   :  { %295 = dma.done.wait [#allocation5], 16  }
 0x126   :  { %296 = vsyncadd [#allocation5], 4294967280 }
 0x127   :  { %198 = sfence }
 0x128   :  { %199 = vsyncpa [#allocation4], 1 }
 0x129   :  { %200 = vsyncpa [#allocation7], 1 }
 0x12a   :  { %201 = vsyncpa [#allocation5], 1 }

</bundles_post_ra>
